<compile_context>
chip_gen: v7x
topology: tpu7x:2x2x1
jax: 0.10.0
libtpu: 0.0.40
codegen_flags: <defaults>
</compile_context>

<pallas_src>
import functools
from dataclasses import dataclass

import jax
import jax.numpy as jnp
from jax.experimental import pallas as pl
from jax.experimental.pallas import tpu as pltpu


@dataclass(frozen=True)
class MlpConfig:
    in_features: int
    hidden_features: int
    out_features: int
    hidden_layers: int


LN_EPS = 1e-5          # torch.nn.LayerNorm default
LEAKY_SLOPE = 0.01     # torch.nn.LeakyReLU default negative_slope
LANE = 128
SUBLANE = 8


def _round_up(v, m):
    return ((v + m - 1) // m) * m


def _make_const_spec_factory():
    """BlockSpec factory for grid-invariant (constant index_map) operands.

    Uses pipeline_mode=pl.Buffered(1) so constants are single-buffered (half
    the resident VMEM vs. the default double-buffering).  Falls back to a
    plain BlockSpec on older JAX versions.  Returns (factory, buffer_factor).
    """
    if hasattr(pl, "Buffered"):
        try:
            pl.BlockSpec((SUBLANE, LANE), lambda i: (0, 0),
                         pipeline_mode=pl.Buffered(1))

            def f(shape):
                return pl.BlockSpec(shape, lambda i: (0, 0),
                                    pipeline_mode=pl.Buffered(1))
            return f, 1
        except TypeError:
            pass

    def f(shape):
        return pl.BlockSpec(shape, lambda i: (0, 0))
    return f, 2


_CONST_SPEC, _PARAM_BUF_FACTOR = _make_const_spec_factory()


def _vmem_capacity_bytes():
    """Physical VMEM per TensorCore; conservative fallback = 64 MiB (v7x)."""
    try:
        return int(pltpu.get_tpu_info().vmem_capacity_bytes)
    except Exception:
        return 64 << 20


def _mlp_fused_kernel(*refs, layer_specs):
    """All (Linear -> LayerNorm -> LeakyReLU) layers on one batch tile.

    refs = (x_ref, [w, b, gamma, beta] * L, o_ref).
    layer_specs is a static tuple of (d_out_real, d_out_pad) per layer; padded
    lanes hold zeros and are excluded from the LayerNorm statistics.
    """
    x_ref = refs[0]
    o_ref = refs[-1]
    p = refs[1:-1]

    # Hoist lane masks out of the unrolled layer loop: one mask per distinct
    # (d_out, d_out_pad).  JAX does not CSE broadcast_in_dim across layers.
    masks = {}
    for d_out, d_out_pad in layer_specs:
        key = (d_out, d_out_pad)
        if d_out != d_out_pad and key not in masks:
            lane = jax.lax.broadcasted_iota(jnp.int32, (1, d_out_pad), 1)
            masks[key] = (lane < d_out).astype(jnp.float32)

    h = x_ref[...]                                        # [tile_n, d_in_pad]
    for l, (d_out, d_out_pad) in enumerate(layer_specs):
        w_ref, b_ref, g_ref, beta_ref = p[4 * l: 4 * l + 4]

        # bf16 operands feed the MXU natively; accumulate in f32.
        y = jnp.dot(h.astype(jnp.bfloat16), w_ref[...],
                    preferred_element_type=jnp.float32)
        y = y + b_ref[...]

        # LayerNorm over the REAL feature width only.  Padded lanes of y are
        # exactly 0 (zero W columns, zero bias pad), so no pre-mask multiply
        # is needed before the mean.
        inv_d = jnp.float32(1.0 / d_out)
        if d_out != d_out_pad:
            mean = jnp.sum(y, axis=-1, keepdims=True) * inv_d
            centered = (y - mean) * masks[(d_out, d_out_pad)]
        else:
            mean = jnp.mean(y, axis=-1, keepdims=True)
            centered = y - mean
        var = jnp.sum(centered * centered, axis=-1, keepdims=True) * inv_d
        y_norm = centered * jax.lax.rsqrt(var + LN_EPS)
        y_norm = y_norm * g_ref[...] + beta_ref[...]

        # LeakyReLU (padded lanes stay exactly zero: beta pad = 0).
        h = jnp.where(y_norm >= 0, y_norm, LEAKY_SLOPE * y_norm)

    o_ref[...] = h.astype(o_ref.dtype)


def mlp_forward(x, params):
    """Fused MLP forward: one pallas_call, grid over batch tiles only.

    x: [N, in_features]; params: sequence of (W:[Din,Dout], b, gamma, beta).
    """
    n, d_in = x.shape
    num_layers = len(params)
    d_outs = [w.shape[1] for (w, _, _, _) in params]
    d_ins = [d_in] + d_outs[:-1]
    d_out_final = d_outs[-1]

    # Lane-dense padding of every feature dim to a multiple of 128.
    d_in_pads = [_round_up(d, LANE) for d in d_ins]
    d_out_pads = [_round_up(d, LANE) for d in d_outs]

    vmem_cap = _vmem_capacity_bytes()
    big_vmem = vmem_cap >= (100 << 20)        # v5e / v6e (128 MiB physical)

    # Batch tiling: generation-aware tile size for large N, otherwise a single
    # minimally (sublane) padded tile.
    n_pad8 = _round_up(n, SUBLANE)
    if n_pad8 <= 256:
        tile_n = n_pad8
    else:
        tile_n = 512 if big_vmem else 256
        if not big_vmem:
            # v7x: 2 TensorCores -> keep an even number of grid steps >= 2.
            steps = pl.cdiv(n_pad8, tile_n)
            if steps < 2 or steps % 2 == 1:
                tile_n = 128
    n_pad = _round_up(n, tile_n)
    grid = (n_pad // tile_n,)
    # TODO(synk): replace batch-remainder padding with a final partial tile
    # (index_map + masked store) to avoid the extra HBM copy for ragged N.

    # Zero-pad activations only when needed; weights stored/padded as bf16
    # (gamma padded with ones; padded lanes never reach the output because
    # centered == 0 there).
    need_x_pad = (n_pad != n) or (d_in_pads[0] != d_in)
    if need_x_pad:
        x_p = jnp.zeros((n_pad, d_in_pads[0]), x.dtype).at[:n, :d_in].set(x)
    else:
        x_p = x

    flat_params = []
    in_specs = [pl.BlockSpec((tile_n, d_in_pads[0]), lambda i: (i, 0))]
    for l, (w, b, g, beta) in enumerate(params):
        dip, dop = d_in_pads[l], d_out_pads[l]
        di, do = d_ins[l], d_outs[l]
        w_p = jnp.zeros((dip, dop), jnp.bfloat16).at[:di, :do].set(
            w.astype(jnp.bfloat16))
        b_p = jnp.zeros((1, dop), jnp.float32).at[0, :do].set(b)
        g_p = jnp.ones((1, dop), jnp.float32).at[0, :do].set(g)
        beta_p = jnp.zeros((1, dop), jnp.float32).at[0, :do].set(beta)
        flat_params += [w_p, b_p, g_p, beta_p]
        # Grid-invariant, single-buffered: DMA'd once, VMEM-resident across
        # all batch tiles.
        in_specs += [
            _CONST_SPEC((dip, dop)),
            _CONST_SPEC((1, dop)),
            _CONST_SPEC((1, dop)),
            _CONST_SPEC((1, dop)),
        ]
    out_spec = pl.BlockSpec((tile_n, d_out_pads[-1]), lambda i: (i, 0))

    # Advisory cost estimate for the XLA scheduler.
    bytes_per = lambda a: int(a.size) * a.dtype.itemsize
    flops = sum(2 * n_pad * d_in_pads[l] * d_out_pads[l]
                for l in range(num_layers))
    bytes_accessed = (bytes_per(x_p) + sum(bytes_per(p) for p in flat_params)
                      + 4 * n_pad * d_out_pads[-1])
    cost = pl.CostEstimate(flops=int(flops),
                           transcendentals=int(n_pad * num_layers),
                           bytes_accessed=int(bytes_accessed))

    # VMEM budget: resident params (single-buffered if Buffered(1) is
    # available), double-buffered x/out tiles, and ~4 live f32 intermediates
    # per layer (y, centered, y_norm, h) plus the bf16 cast copy.
    param_resident = _PARAM_BUF_FACTOR * sum(bytes_per(p) for p in flat_params)
    max_pad = max(d_in_pads + d_out_pads)
    act_live = tile_n * max_pad * (4 * 4 + 2)
    io_buffers = (2 * tile_n * d_in_pads[0] * 4
                  + 2 * tile_n * d_out_pads[-1] * 4)
    vmem_est = param_resident + act_live + io_buffers + (2 << 20)
    vmem_cap_usable = max(vmem_cap - (8 << 20), 32 << 20)   # compiler headroom
    # 16 MiB is the smallest scoped default across generations (v5e).
    vmem_limit = (None if vmem_est <= (16 << 20)
                  else int(min(vmem_est, vmem_cap_usable)))
    # TODO(synk): when bf16 + single-buffered resident weights still exceed
    # ~40 MiB (v7x), add a K/N-tiled "arbitrary" grid axis over W with an
    # accumulator scratch + pl.when init/finalize instead of losing fusion.

    layer_specs = tuple((d_outs[l], d_out_pads[l]) for l in range(num_layers))
    kernel = functools.partial(_mlp_fused_kernel, layer_specs=layer_specs)

    out_p = pl.pallas_call(
        kernel,
        out_shape=jax.ShapeDtypeStruct((n_pad, d_out_pads[-1]), x.dtype),
        grid=grid,
        in_specs=in_specs,
        out_specs=out_spec,
        compiler_params=pltpu.CompilerParams(
            dimension_semantics=("parallel",),
            vmem_limit_bytes=vmem_limit),
        cost_estimate=cost,
    )(x_p, *flat_params)

    if n_pad != n or d_out_pads[-1] != d_out_final:
        return out_p[:n, :d_out_final]
    return out_p


mlp_forward_jit = jax.jit(mlp_forward)


def mlp_reference(x, params):
    """Pure-JAX f32 reference matching the PyTorch module."""
    h = x
    for (w, b, g, beta) in params:
        y = h @ w + b
        mean = jnp.mean(y, axis=-1, keepdims=True)
        var = jnp.mean((y - mean) ** 2, axis=-1, keepdims=True)
        yn = (y - mean) * jax.lax.rsqrt(var + LN_EPS) * g + beta
        h = jnp.where(yn >= 0, yn, LEAKY_SLOPE * yn)
    return h


def init_mlp_params(key, config: MlpConfig):
    """PyTorch-default init: Linear U(-1/sqrt(fan_in), 1/sqrt(fan_in));
    LayerNorm gamma=1, beta=0.  Weights stored as [Din, Dout] (= W.T)."""
    dims = ([config.in_features]
            + [config.hidden_features] * (config.hidden_layers + 1)
            + [config.out_features])
    params = []
    for i in range(len(dims) - 1):
        d_in, d_out = dims[i], dims[i + 1]
        key, kw, kb = jax.random.split(key, 3)
        bound = 1.0 / float(d_in) ** 0.5
        w = jax.random.uniform(kw, (d_in, d_out), jnp.float32, -bound, bound)
        b = jax.random.uniform(kb, (d_out,), jnp.float32, -bound, bound)
        gamma = jnp.ones((d_out,), jnp.float32)
        beta = jnp.zeros((d_out,), jnp.float32)
        params.append((w, b, gamma, beta))
    return tuple(params)


if __name__ == "__main__":
    config = MlpConfig(in_features=16, hidden_features=32,
                       out_features=8, hidden_layers=2)

    key = jax.random.PRNGKey(0)
    key, kx = jax.random.split(key)
    x = jax.random.normal(kx, (8, config.in_features), jnp.float32)
    params = init_mlp_params(key, config)

    out = mlp_forward_jit(x, params)
    jax.block_until_ready(out)

    ref = mlp_reference(x, params)
    assert out.shape == (8, config.out_features)
    assert jnp.all(jnp.isfinite(out))
    # bf16 MXU operands -> loosened tolerance vs the f32 reference.
    assert jnp.allclose(out, ref, rtol=5e-2, atol=5e-2), (
        float(jnp.max(jnp.abs(out - ref))))
    print("KERNEL_OK")
</pallas_src>

<mosaic_0001>
module attributes {stable_mosaic.version = 11 : i64} {
  func.func @_mlp_fused_kernel(%arg0: i32, %arg1: memref<8x128xf32, #tpu.memory_space<vmem>>, %arg2: memref<128x128xbf16, #tpu.memory_space<vmem>>, %arg3: memref<1x128xf32, #tpu.memory_space<vmem>>, %arg4: memref<1x128xf32, #tpu.memory_space<vmem>>, %arg5: memref<1x128xf32, #tpu.memory_space<vmem>>, %arg6: memref<128x128xbf16, #tpu.memory_space<vmem>>, %arg7: memref<1x128xf32, #tpu.memory_space<vmem>>, %arg8: memref<1x128xf32, #tpu.memory_space<vmem>>, %arg9: memref<1x128xf32, #tpu.memory_space<vmem>>, %arg10: memref<128x128xbf16, #tpu.memory_space<vmem>>, %arg11: memref<1x128xf32, #tpu.memory_space<vmem>>, %arg12: memref<1x128xf32, #tpu.memory_space<vmem>>, %arg13: memref<1x128xf32, #tpu.memory_space<vmem>>, %arg14: memref<128x128xbf16, #tpu.memory_space<vmem>>, %arg15: memref<1x128xf32, #tpu.memory_space<vmem>>, %arg16: memref<1x128xf32, #tpu.memory_space<vmem>>, %arg17: memref<1x128xf32, #tpu.memory_space<vmem>>, %arg18: memref<8x128xf32, #tpu.memory_space<vmem>>) attributes {dimension_semantics = [#tpu.dimension_semantics<parallel>], iteration_bounds = array<i64: 1>, scalar_prefetch = 0 : i64, scratch_operands = 0 : i64, tpu.core_type = #tpu.core_type<tc>, window_params = [{transform_indices = @transform_0, window_bounds = array<i64: 8, 128>}, {pipeline_mode = #tpu.pipeline_mode<synchronous>, transform_indices = @transform_1, window_bounds = array<i64: 128, 128>}, {pipeline_mode = #tpu.pipeline_mode<synchronous>, transform_indices = @transform_2, window_bounds = array<i64: 1, 128>}, {pipeline_mode = #tpu.pipeline_mode<synchronous>, transform_indices = @transform_3, window_bounds = array<i64: 1, 128>}, {pipeline_mode = #tpu.pipeline_mode<synchronous>, transform_indices = @transform_4, window_bounds = array<i64: 1, 128>}, {pipeline_mode = #tpu.pipeline_mode<synchronous>, transform_indices = @transform_5, window_bounds = array<i64: 128, 128>}, {pipeline_mode = #tpu.pipeline_mode<synchronous>, transform_indices = @transform_6, window_bounds = array<i64: 1, 128>}, {pipeline_mode = #tpu.pipeline_mode<synchronous>, transform_indices = @transform_7, window_bounds = array<i64: 1, 128>}, {pipeline_mode = #tpu.pipeline_mode<synchronous>, transform_indices = @transform_8, window_bounds = array<i64: 1, 128>}, {pipeline_mode = #tpu.pipeline_mode<synchronous>, transform_indices = @transform_9, window_bounds = array<i64: 128, 128>}, {pipeline_mode = #tpu.pipeline_mode<synchronous>, transform_indices = @transform_10, window_bounds = array<i64: 1, 128>}, {pipeline_mode = #tpu.pipeline_mode<synchronous>, transform_indices = @transform_11, window_bounds = array<i64: 1, 128>}, {pipeline_mode = #tpu.pipeline_mode<synchronous>, transform_indices = @transform_12, window_bounds = array<i64: 1, 128>}, {pipeline_mode = #tpu.pipeline_mode<synchronous>, transform_indices = @transform_13, window_bounds = array<i64: 128, 128>}, {pipeline_mode = #tpu.pipeline_mode<synchronous>, transform_indices = @transform_14, window_bounds = array<i64: 1, 128>}, {pipeline_mode = #tpu.pipeline_mode<synchronous>, transform_indices = @transform_15, window_bounds = array<i64: 1, 128>}, {pipeline_mode = #tpu.pipeline_mode<synchronous>, transform_indices = @transform_16, window_bounds = array<i64: 1, 128>}, {transform_indices = @transform_17, window_bounds = array<i64: 8, 128>}]} {
    %0 = tpu.iota {dimensions = array<i32: 1>} : vector<1x128xi32>
    %c32_i32 = arith.constant 32 : i32
    %1 = vector.broadcast %c32_i32 : i32 to vector<1x128xi32>
    %2 = arith.cmpi slt, %0, %1 : vector<1x128xi32>
    %3 = arith.extui %2 : vector<1x128xi1> to vector<1x128xi32>
    %4 = arith.sitofp %3 : vector<1x128xi32> to vector<1x128xf32>
    %5 = tpu.iota {dimensions = array<i32: 1>} : vector<1x128xi32>
    %c8_i32 = arith.constant 8 : i32
    %6 = vector.broadcast %c8_i32 : i32 to vector<1x128xi32>
    %7 = arith.cmpi slt, %5, %6 : vector<1x128xi32>
    %8 = arith.extui %7 : vector<1x128xi1> to vector<1x128xi32>
    %9 = arith.sitofp %8 : vector<1x128xi32> to vector<1x128xf32>
    %c0 = arith.constant 0 : index
    %c0_0 = arith.constant 0 : index
    %10 = vector.load %arg1[%c0, %c0_0] : memref<8x128xf32, #tpu.memory_space<vmem>>, vector<8x128xf32>
    %11 = arith.truncf %10 : vector<8x128xf32> to vector<8x128xbf16>
    %c0_1 = arith.constant 0 : index
    %c0_2 = arith.constant 0 : index
    %12 = vector.load %arg2[%c0_1, %c0_2] : memref<128x128xbf16, #tpu.memory_space<vmem>>, vector<128x128xbf16>
    %cst = arith.constant dense<0.000000e+00> : vector<8x128xf32>
    %13 = tpu.matmul %11, %12, %cst {dimension_numbers = #tpu.dot_dimension_numbers<[1], [0], [0], [1], [0, 0, 1, 1], [], []>} : vector<8x128xbf16>, vector<128x128xbf16>, vector<8x128xf32> -> vector<8x128xf32>
    %c0_3 = arith.constant 0 : index
    %c0_4 = arith.constant 0 : index
    %14 = vector.load %arg3[%c0_3, %c0_4] : memref<1x128xf32, #tpu.memory_space<vmem>>, vector<1x128xf32>
    %15 = vector.broadcast %14 : vector<1x128xf32> to vector<8x128xf32>
    %16 = arith.addf %13, %15 : vector<8x128xf32>
    %cst_5 = arith.constant dense<0.000000e+00> : vector<8xf32>
    %17 = vector.multi_reduction <add>, %16, %cst_5 [1] : vector<8x128xf32> to vector<8xf32>
    %18 = vector.shape_cast %17 : vector<8xf32> to vector<8x1xf32>
    %cst_6 = arith.constant 3.125000e-02 : f32
    %19 = vector.broadcast %cst_6 : f32 to vector<8x1xf32>
    %20 = arith.mulf %18, %19 : vector<8x1xf32>
    %21 = vector.broadcast %20 : vector<8x1xf32> to vector<8x128xf32>
    %22 = arith.subf %16, %21 : vector<8x128xf32>
    %23 = vector.broadcast %4 : vector<1x128xf32> to vector<8x128xf32>
    %24 = arith.mulf %22, %23 : vector<8x128xf32>
    %25 = arith.mulf %24, %24 : vector<8x128xf32>
    %cst_7 = arith.constant dense<0.000000e+00> : vector<8xf32>
    %26 = vector.multi_reduction <add>, %25, %cst_7 [1] : vector<8x128xf32> to vector<8xf32>
    %27 = vector.shape_cast %26 : vector<8xf32> to vector<8x1xf32>
    %cst_8 = arith.constant 3.125000e-02 : f32
    %28 = vector.broadcast %cst_8 : f32 to vector<8x1xf32>
    %29 = arith.mulf %27, %28 : vector<8x1xf32>
    %cst_9 = arith.constant 9.99999974E-6 : f32
    %30 = vector.broadcast %cst_9 : f32 to vector<8x1xf32>
    %31 = arith.addf %29, %30 : vector<8x1xf32>
    %32 = math.rsqrt %31 : vector<8x1xf32>
    %33 = vector.broadcast %32 : vector<8x1xf32> to vector<8x128xf32>
    %34 = arith.mulf %24, %33 : vector<8x128xf32>
    %c0_10 = arith.constant 0 : index
    %c0_11 = arith.constant 0 : index
    %35 = vector.load %arg4[%c0_10, %c0_11] : memref<1x128xf32, #tpu.memory_space<vmem>>, vector<1x128xf32>
    %36 = vector.broadcast %35 : vector<1x128xf32> to vector<8x128xf32>
    %37 = arith.mulf %34, %36 : vector<8x128xf32>
    %c0_12 = arith.constant 0 : index
    %c0_13 = arith.constant 0 : index
    %38 = vector.load %arg5[%c0_12, %c0_13] : memref<1x128xf32, #tpu.memory_space<vmem>>, vector<1x128xf32>
    %39 = vector.broadcast %38 : vector<1x128xf32> to vector<8x128xf32>
    %40 = arith.addf %37, %39 : vector<8x128xf32>
    %cst_14 = arith.constant 0.000000e+00 : f32
    %41 = vector.broadcast %cst_14 : f32 to vector<8x128xf32>
    %42 = arith.cmpf oge, %40, %41 : vector<8x128xf32>
    %cst_15 = arith.constant 0.00999999977 : f32
    %43 = vector.broadcast %cst_15 : f32 to vector<8x128xf32>
    %44 = arith.mulf %43, %40 : vector<8x128xf32>
    %45 = arith.select %42, %40, %44 : vector<8x128xi1>, vector<8x128xf32>
    %46 = arith.truncf %45 : vector<8x128xf32> to vector<8x128xbf16>
    %c0_16 = arith.constant 0 : index
    %c0_17 = arith.constant 0 : index
    %47 = vector.load %arg6[%c0_16, %c0_17] : memref<128x128xbf16, #tpu.memory_space<vmem>>, vector<128x128xbf16>
    %cst_18 = arith.constant dense<0.000000e+00> : vector<8x128xf32>
    %48 = tpu.matmul %46, %47, %cst_18 {dimension_numbers = #tpu.dot_dimension_numbers<[1], [0], [0], [1], [0, 0, 1, 1], [], []>} : vector<8x128xbf16>, vector<128x128xbf16>, vector<8x128xf32> -> vector<8x128xf32>
    %c0_19 = arith.constant 0 : index
    %c0_20 = arith.constant 0 : index
    %49 = vector.load %arg7[%c0_19, %c0_20] : memref<1x128xf32, #tpu.memory_space<vmem>>, vector<1x128xf32>
    %50 = vector.broadcast %49 : vector<1x128xf32> to vector<8x128xf32>
    %51 = arith.addf %48, %50 : vector<8x128xf32>
    %cst_21 = arith.constant dense<0.000000e+00> : vector<8xf32>
    %52 = vector.multi_reduction <add>, %51, %cst_21 [1] : vector<8x128xf32> to vector<8xf32>
    %53 = vector.shape_cast %52 : vector<8xf32> to vector<8x1xf32>
    %cst_22 = arith.constant 3.125000e-02 : f32
    %54 = vector.broadcast %cst_22 : f32 to vector<8x1xf32>
    %55 = arith.mulf %53, %54 : vector<8x1xf32>
    %56 = vector.broadcast %55 : vector<8x1xf32> to vector<8x128xf32>
    %57 = arith.subf %51, %56 : vector<8x128xf32>
    %58 = vector.broadcast %4 : vector<1x128xf32> to vector<8x128xf32>
    %59 = arith.mulf %57, %58 : vector<8x128xf32>
    %60 = arith.mulf %59, %59 : vector<8x128xf32>
    %cst_23 = arith.constant dense<0.000000e+00> : vector<8xf32>
    %61 = vector.multi_reduction <add>, %60, %cst_23 [1] : vector<8x128xf32> to vector<8xf32>
    %62 = vector.shape_cast %61 : vector<8xf32> to vector<8x1xf32>
    %cst_24 = arith.constant 3.125000e-02 : f32
    %63 = vector.broadcast %cst_24 : f32 to vector<8x1xf32>
    %64 = arith.mulf %62, %63 : vector<8x1xf32>
    %cst_25 = arith.constant 9.99999974E-6 : f32
    %65 = vector.broadcast %cst_25 : f32 to vector<8x1xf32>
    %66 = arith.addf %64, %65 : vector<8x1xf32>
    %67 = math.rsqrt %66 : vector<8x1xf32>
    %68 = vector.broadcast %67 : vector<8x1xf32> to vector<8x128xf32>
    %69 = arith.mulf %59, %68 : vector<8x128xf32>
    %c0_26 = arith.constant 0 : index
    %c0_27 = arith.constant 0 : index
    %70 = vector.load %arg8[%c0_26, %c0_27] : memref<1x128xf32, #tpu.memory_space<vmem>>, vector<1x128xf32>
    %71 = vector.broadcast %70 : vector<1x128xf32> to vector<8x128xf32>
    %72 = arith.mulf %69, %71 : vector<8x128xf32>
    %c0_28 = arith.constant 0 : index
    %c0_29 = arith.constant 0 : index
    %73 = vector.load %arg9[%c0_28, %c0_29] : memref<1x128xf32, #tpu.memory_space<vmem>>, vector<1x128xf32>
    %74 = vector.broadcast %73 : vector<1x128xf32> to vector<8x128xf32>
    %75 = arith.addf %72, %74 : vector<8x128xf32>
    %cst_30 = arith.constant 0.000000e+00 : f32
    %76 = vector.broadcast %cst_30 : f32 to vector<8x128xf32>
    %77 = arith.cmpf oge, %75, %76 : vector<8x128xf32>
    %cst_31 = arith.constant 0.00999999977 : f32
    %78 = vector.broadcast %cst_31 : f32 to vector<8x128xf32>
    %79 = arith.mulf %78, %75 : vector<8x128xf32>
    %80 = arith.select %77, %75, %79 : vector<8x128xi1>, vector<8x128xf32>
    %81 = arith.truncf %80 : vector<8x128xf32> to vector<8x128xbf16>
    %c0_32 = arith.constant 0 : index
    %c0_33 = arith.constant 0 : index
    %82 = vector.load %arg10[%c0_32, %c0_33] : memref<128x128xbf16, #tpu.memory_space<vmem>>, vector<128x128xbf16>
    %cst_34 = arith.constant dense<0.000000e+00> : vector<8x128xf32>
    %83 = tpu.matmul %81, %82, %cst_34 {dimension_numbers = #tpu.dot_dimension_numbers<[1], [0], [0], [1], [0, 0, 1, 1], [], []>} : vector<8x128xbf16>, vector<128x128xbf16>, vector<8x128xf32> -> vector<8x128xf32>
    %c0_35 = arith.constant 0 : index
    %c0_36 = arith.constant 0 : index
    %84 = vector.load %arg11[%c0_35, %c0_36] : memref<1x128xf32, #tpu.memory_space<vmem>>, vector<1x128xf32>
    %85 = vector.broadcast %84 : vector<1x128xf32> to vector<8x128xf32>
    %86 = arith.addf %83, %85 : vector<8x128xf32>
    %cst_37 = arith.constant dense<0.000000e+00> : vector<8xf32>
    %87 = vector.multi_reduction <add>, %86, %cst_37 [1] : vector<8x128xf32> to vector<8xf32>
    %88 = vector.shape_cast %87 : vector<8xf32> to vector<8x1xf32>
    %cst_38 = arith.constant 3.125000e-02 : f32
    %89 = vector.broadcast %cst_38 : f32 to vector<8x1xf32>
    %90 = arith.mulf %88, %89 : vector<8x1xf32>
    %91 = vector.broadcast %90 : vector<8x1xf32> to vector<8x128xf32>
    %92 = arith.subf %86, %91 : vector<8x128xf32>
    %93 = vector.broadcast %4 : vector<1x128xf32> to vector<8x128xf32>
    %94 = arith.mulf %92, %93 : vector<8x128xf32>
    %95 = arith.mulf %94, %94 : vector<8x128xf32>
    %cst_39 = arith.constant dense<0.000000e+00> : vector<8xf32>
    %96 = vector.multi_reduction <add>, %95, %cst_39 [1] : vector<8x128xf32> to vector<8xf32>
    %97 = vector.shape_cast %96 : vector<8xf32> to vector<8x1xf32>
    %cst_40 = arith.constant 3.125000e-02 : f32
    %98 = vector.broadcast %cst_40 : f32 to vector<8x1xf32>
    %99 = arith.mulf %97, %98 : vector<8x1xf32>
    %cst_41 = arith.constant 9.99999974E-6 : f32
    %100 = vector.broadcast %cst_41 : f32 to vector<8x1xf32>
    %101 = arith.addf %99, %100 : vector<8x1xf32>
    %102 = math.rsqrt %101 : vector<8x1xf32>
    %103 = vector.broadcast %102 : vector<8x1xf32> to vector<8x128xf32>
    %104 = arith.mulf %94, %103 : vector<8x128xf32>
    %c0_42 = arith.constant 0 : index
    %c0_43 = arith.constant 0 : index
    %105 = vector.load %arg12[%c0_42, %c0_43] : memref<1x128xf32, #tpu.memory_space<vmem>>, vector<1x128xf32>
    %106 = vector.broadcast %105 : vector<1x128xf32> to vector<8x128xf32>
    %107 = arith.mulf %104, %106 : vector<8x128xf32>
    %c0_44 = arith.constant 0 : index
    %c0_45 = arith.constant 0 : index
    %108 = vector.load %arg13[%c0_44, %c0_45] : memref<1x128xf32, #tpu.memory_space<vmem>>, vector<1x128xf32>
    %109 = vector.broadcast %108 : vector<1x128xf32> to vector<8x128xf32>
    %110 = arith.addf %107, %109 : vector<8x128xf32>
    %cst_46 = arith.constant 0.000000e+00 : f32
    %111 = vector.broadcast %cst_46 : f32 to vector<8x128xf32>
    %112 = arith.cmpf oge, %110, %111 : vector<8x128xf32>
    %cst_47 = arith.constant 0.00999999977 : f32
    %113 = vector.broadcast %cst_47 : f32 to vector<8x128xf32>
    %114 = arith.mulf %113, %110 : vector<8x128xf32>
    %115 = arith.select %112, %110, %114 : vector<8x128xi1>, vector<8x128xf32>
    %116 = arith.truncf %115 : vector<8x128xf32> to vector<8x128xbf16>
    %c0_48 = arith.constant 0 : index
    %c0_49 = arith.constant 0 : index
    %117 = vector.load %arg14[%c0_48, %c0_49] : memref<128x128xbf16, #tpu.memory_space<vmem>>, vector<128x128xbf16>
    %cst_50 = arith.constant dense<0.000000e+00> : vector<8x128xf32>
    %118 = tpu.matmul %116, %117, %cst_50 {dimension_numbers = #tpu.dot_dimension_numbers<[1], [0], [0], [1], [0, 0, 1, 1], [], []>} : vector<8x128xbf16>, vector<128x128xbf16>, vector<8x128xf32> -> vector<8x128xf32>
    %c0_51 = arith.constant 0 : index
    %c0_52 = arith.constant 0 : index
    %119 = vector.load %arg15[%c0_51, %c0_52] : memref<1x128xf32, #tpu.memory_space<vmem>>, vector<1x128xf32>
    %120 = vector.broadcast %119 : vector<1x128xf32> to vector<8x128xf32>
    %121 = arith.addf %118, %120 : vector<8x128xf32>
    %cst_53 = arith.constant dense<0.000000e+00> : vector<8xf32>
    %122 = vector.multi_reduction <add>, %121, %cst_53 [1] : vector<8x128xf32> to vector<8xf32>
    %123 = vector.shape_cast %122 : vector<8xf32> to vector<8x1xf32>
    %cst_54 = arith.constant 1.250000e-01 : f32
    %124 = vector.broadcast %cst_54 : f32 to vector<8x1xf32>
    %125 = arith.mulf %123, %124 : vector<8x1xf32>
    %126 = vector.broadcast %125 : vector<8x1xf32> to vector<8x128xf32>
    %127 = arith.subf %121, %126 : vector<8x128xf32>
    %128 = vector.broadcast %9 : vector<1x128xf32> to vector<8x128xf32>
    %129 = arith.mulf %127, %128 : vector<8x128xf32>
    %130 = arith.mulf %129, %129 : vector<8x128xf32>
    %cst_55 = arith.constant dense<0.000000e+00> : vector<8xf32>
    %131 = vector.multi_reduction <add>, %130, %cst_55 [1] : vector<8x128xf32> to vector<8xf32>
    %132 = vector.shape_cast %131 : vector<8xf32> to vector<8x1xf32>
    %cst_56 = arith.constant 1.250000e-01 : f32
    %133 = vector.broadcast %cst_56 : f32 to vector<8x1xf32>
    %134 = arith.mulf %132, %133 : vector<8x1xf32>
    %cst_57 = arith.constant 9.99999974E-6 : f32
    %135 = vector.broadcast %cst_57 : f32 to vector<8x1xf32>
    %136 = arith.addf %134, %135 : vector<8x1xf32>
    %137 = math.rsqrt %136 : vector<8x1xf32>
    %138 = vector.broadcast %137 : vector<8x1xf32> to vector<8x128xf32>
    %139 = arith.mulf %129, %138 : vector<8x128xf32>
    %c0_58 = arith.constant 0 : index
    %c0_59 = arith.constant 0 : index
    %140 = vector.load %arg16[%c0_58, %c0_59] : memref<1x128xf32, #tpu.memory_space<vmem>>, vector<1x128xf32>
    %141 = vector.broadcast %140 : vector<1x128xf32> to vector<8x128xf32>
    %142 = arith.mulf %139, %141 : vector<8x128xf32>
    %c0_60 = arith.constant 0 : index
    %c0_61 = arith.constant 0 : index
    %143 = vector.load %arg17[%c0_60, %c0_61] : memref<1x128xf32, #tpu.memory_space<vmem>>, vector<1x128xf32>
    %144 = vector.broadcast %143 : vector<1x128xf32> to vector<8x128xf32>
    %145 = arith.addf %142, %144 : vector<8x128xf32>
    %cst_62 = arith.constant 0.000000e+00 : f32
    %146 = vector.broadcast %cst_62 : f32 to vector<8x128xf32>
    %147 = arith.cmpf oge, %145, %146 : vector<8x128xf32>
    %cst_63 = arith.constant 0.00999999977 : f32
    %148 = vector.broadcast %cst_63 : f32 to vector<8x128xf32>
    %149 = arith.mulf %148, %145 : vector<8x128xf32>
    %150 = arith.select %147, %145, %149 : vector<8x128xi1>, vector<8x128xf32>
    %c0_64 = arith.constant 0 : index
    %c0_65 = arith.constant 0 : index
    %151 = vector.load %arg18[%c0_64, %c0_65] : memref<8x128xf32, #tpu.memory_space<vmem>>, vector<8x128xf32>
    tpu.vector_store %arg18[%c0_64, %c0_65], %150 {strides = array<i32>} : memref<8x128xf32, #tpu.memory_space<vmem>>, vector<8x128xf32>,
    return
  }
  func.func @transform_0(%arg0: i32) -> (i32, i32) {
    %c0_i32 = arith.constant 0 : i32
    %c0_i32_0 = arith.constant 0 : i32
    return %arg0, %c0_i32 : i32, i32
  }
  func.func @transform_1(%arg0: i32) -> (i32, i32) {
    %c0_i32 = arith.constant 0 : i32
    %c0_i32_0 = arith.constant 0 : i32
    %c0_i32_1 = arith.constant 0 : i32
    return %c0_i32, %c0_i32_0 : i32, i32
  }
  func.func @transform_2(%arg0: i32) -> (i32, i32) {
    %c0_i32 = arith.constant 0 : i32
    %c0_i32_0 = arith.constant 0 : i32
    %c0_i32_1 = arith.constant 0 : i32
    return %c0_i32, %c0_i32_0 : i32, i32
  }
  func.func @transform_3(%arg0: i32) -> (i32, i32) {
    %c0_i32 = arith.constant 0 : i32
    %c0_i32_0 = arith.constant 0 : i32
    %c0_i32_1 = arith.constant 0 : i32
    return %c0_i32, %c0_i32_0 : i32, i32
  }
  func.func @transform_4(%arg0: i32) -> (i32, i32) {
    %c0_i32 = arith.constant 0 : i32
    %c0_i32_0 = arith.constant 0 : i32
    %c0_i32_1 = arith.constant 0 : i32
    return %c0_i32, %c0_i32_0 : i32, i32
  }
  func.func @transform_5(%arg0: i32) -> (i32, i32) {
    %c0_i32 = arith.constant 0 : i32
    %c0_i32_0 = arith.constant 0 : i32
    %c0_i32_1 = arith.constant 0 : i32
    return %c0_i32, %c0_i32_0 : i32, i32
  }
  func.func @transform_6(%arg0: i32) -> (i32, i32) {
    %c0_i32 = arith.constant 0 : i32
    %c0_i32_0 = arith.constant 0 : i32
    %c0_i32_1 = arith.constant 0 : i32
    return %c0_i32, %c0_i32_0 : i32, i32
  }
  func.func @transform_7(%arg0: i32) -> (i32, i32) {
    %c0_i32 = arith.constant 0 : i32
    %c0_i32_0 = arith.constant 0 : i32
    %c0_i32_1 = arith.constant 0 : i32
    return %c0_i32, %c0_i32_0 : i32, i32
  }
  func.func @transform_8(%arg0: i32) -> (i32, i32) {
    %c0_i32 = arith.constant 0 : i32
    %c0_i32_0 = arith.constant 0 : i32
    %c0_i32_1 = arith.constant 0 : i32
    return %c0_i32, %c0_i32_0 : i32, i32
  }
  func.func @transform_9(%arg0: i32) -> (i32, i32) {
    %c0_i32 = arith.constant 0 : i32
    %c0_i32_0 = arith.constant 0 : i32
    %c0_i32_1 = arith.constant 0 : i32
    return %c0_i32, %c0_i32_0 : i32, i32
  }
  func.func @transform_10(%arg0: i32) -> (i32, i32) {
    %c0_i32 = arith.constant 0 : i32
    %c0_i32_0 = arith.constant 0 : i32
    %c0_i32_1 = arith.constant 0 : i32
    return %c0_i32, %c0_i32_0 : i32, i32
  }
  func.func @transform_11(%arg0: i32) -> (i32, i32) {
    %c0_i32 = arith.constant 0 : i32
    %c0_i32_0 = arith.constant 0 : i32
    %c0_i32_1 = arith.constant 0 : i32
    return %c0_i32, %c0_i32_0 : i32, i32
  }
  func.func @transform_12(%arg0: i32) -> (i32, i32) {
    %c0_i32 = arith.constant 0 : i32
    %c0_i32_0 = arith.constant 0 : i32
    %c0_i32_1 = arith.constant 0 : i32
    return %c0_i32, %c0_i32_0 : i32, i32
  }
  func.func @transform_13(%arg0: i32) -> (i32, i32) {
    %c0_i32 = arith.constant 0 : i32
    %c0_i32_0 = arith.constant 0 : i32
    %c0_i32_1 = arith.constant 0 : i32
    return %c0_i32, %c0_i32_0 : i32, i32
  }
  func.func @transform_14(%arg0: i32) -> (i32, i32) {
    %c0_i32 = arith.constant 0 : i32
    %c0_i32_0 = arith.constant 0 : i32
    %c0_i32_1 = arith.constant 0 : i32
    return %c0_i32, %c0_i32_0 : i32, i32
  }
  func.func @transform_15(%arg0: i32) -> (i32, i32) {
    %c0_i32 = arith.constant 0 : i32
    %c0_i32_0 = arith.constant 0 : i32
    %c0_i32_1 = arith.constant 0 : i32
    return %c0_i32, %c0_i32_0 : i32, i32
  }
  func.func @transform_16(%arg0: i32) -> (i32, i32) {
    %c0_i32 = arith.constant 0 : i32
    %c0_i32_0 = arith.constant 0 : i32
    %c0_i32_1 = arith.constant 0 : i32
    return %c0_i32, %c0_i32_0 : i32, i32
  }
  func.func @transform_17(%arg0: i32) -> (i32, i32) {
    %c0_i32 = arith.constant 0 : i32
    %c0_i32_0 = arith.constant 0 : i32
    return %arg0, %c0_i32 : i32, i32
  }
}

</mosaic_0001>

<bundles_post_ra>
// kernel: mlp_forward.1
= control target key start
LH: loop header
LB: loop body
LE: loop exit
PB: predicated region body
PF: predicated region fallthrough
CT: control target
= control target key end

     0   :  { %s1174_s0 = inlined_call_operand.vmem [shape: f32[8,128], index: 0, kind: input, shape index: {}]   ;;  %s1175_s1 = inlined_call_operand.vmem [shape: bf16[128,128], index: 1, kind: input, shape index: {}]   ;;  %s1176_s2 = inlined_call_operand.vmem [shape: f32[1,128], index: 2, kind: input, shape index: {}]   ;;  %s1177_s3 = inlined_call_operand.vmem [shape: f32[1,128], index: 3, kind: input, shape index: {}]   ;;  %s1178_s4 = inlined_call_operand.vmem [shape: f32[1,128], index: 4, kind: input, shape index: {}]   ;;  %s1179_s5 = inlined_call_operand.vmem [shape: bf16[128,128], index: 5, kind: input, shape index: {}]   ;;  %s1180_s6 = inlined_call_operand.vmem [shape: f32[1,128], index: 6, kind: input, shape index: {}]   ;;  %s1181_s7 = inlined_call_operand.vmem [shape: f32[1,128], index: 7, kind: input, shape index: {}]   ;;  %s1182_s8 = inlined_call_operand.vmem [shape: f32[1,128], index: 8, kind: input, shape index: {}]   ;;  %s1183_s9 = inlined_call_operand.vmem [shape: bf16[128,128], index: 9, kind: input, shape index: {}]   ;;  %s1184_s10 = inlined_call_operand.vmem [shape: f32[1,128], index: 10, kind: input, shape index: {}]   ;;  %s1185_s11 = inlined_call_operand.vmem [shape: f32[1,128], index: 11, kind: input, shape index: {}]   ;;  %s1186_s12 = inlined_call_operand.vmem [shape: f32[1,128], index: 12, kind: input, shape index: {}]   ;;  %s1187_s13 = inlined_call_operand.vmem [shape: bf16[128,128], index: 13, kind: input, shape index: {}]   ;;  %s1188_s14 = inlined_call_operand.vmem [shape: f32[1,128], index: 14, kind: input, shape index: {}]   ;;  %s1189_s15 = inlined_call_operand.vmem [shape: f32[1,128], index: 15, kind: input, shape index: {}]   ;;  %s1190_s16 = inlined_call_operand.vmem [shape: f32[1,128], index: 16, kind: input, shape index: {}]   ;;  %s1191_s17 = inlined_call_operand.hbm [shape: f32[8,128], index: 17, kind: output, shape index: {}]  }
   0x1   :  { %1193 = sst [smem:[#allocation5_spill]] %s1174_s0 }
   0x2   :  { %1194 = sst [smem:[#allocation6_spill]] %s1175_s1 }
   0x3   :  { %s1195_s26 = sld [smem:[#allocation6_spill]]  ;;  %v883_v1 = vmov 0.0   ;;  %vm884_vm0 = vmmov 0  }
   0x4   :  { %736 = vmatprep.subr.bf16.mxu0 %v883_v1  ;;  %756 = vmatprep.subr.bf16.mxu1 %v883_v1 }
   0x5   :  { %752 = vmatprep.mubr.msk.bf16.mxu0 %vm884_vm0, %v883_v1  ;;  %772 = vmatprep.mubr.msk.bf16.mxu1 %vm884_vm0, %v883_v1 }
   0x9   :  { %v819_v0 = vld [vmem:[%s1195_s26] sm:$0xff]   ;;  %v820_v2 = vld [vmem:[%s1195_s26 + $0x8] sm:$0xff]   ;;  %v821_v3 = vld [vmem:[%s1195_s26 + $0x10] sm:$0xff]  }
   0xa   :  { %737 = vmatpush3.bf16.msra.mxu0 %v819_v0  ;;  %v822_v4 = vld [vmem:[%s1195_s26 + $0x18] sm:$0xff]   ;;  %v823_v5 = vld [vmem:[%s1195_s26 + $0x20] sm:$0xff]   ;;  %v824_v6 = vld [vmem:[%s1195_s26 + $0x28] sm:$0xff]  }
   0xb   :  { %738 = vmatprep.subr.bf16.mxu0 %v883_v1  ;;  %v825_v7 = vld [vmem:[%s1195_s26 + $0x30] sm:$0xff]  }
   0xe   :  { %739 = vmatpush3.bf16.msra.mxu0 %v820_v2 }
   0xf   :  { %740 = vmatprep.subr.bf16.mxu0 %v883_v1 }
  0x12   :  { %741 = vmatpush3.bf16.msra.mxu0 %v821_v3 }
  0x13   :  { %742 = vmatprep.subr.bf16.mxu0 %v883_v1 }
  0x16   :  { %743 = vmatpush3.bf16.msra.mxu0 %v822_v4 }
  0x17   :  { %744 = vmatprep.subr.bf16.mxu0 %v883_v1 }
  0x1a   :  { %745 = vmatpush3.bf16.msra.mxu0 %v823_v5 }
  0x1b   :  { %746 = vmatprep.subr.bf16.mxu0 %v883_v1 }
  0x1e   :  { %747 = vmatpush3.bf16.msra.mxu0 %v824_v6 }
  0x1f   :  { %748 = vmatprep.subr.bf16.mxu0 %v883_v1 }
  0x20   :  { %22 = vsyncpa [#allocation3], 0  ;;  %v826_v8 = vld [vmem:[%s1195_s26 + $0x38] sm:$0xff]   ;;  %s1196_s29 = sld [smem:[#allocation5_spill]]  ;;  %v656_v11 = vld [vmem:[%s1176_s2] ss:$0 sm:$0xff]  ;;  %v58_v19 = vlaneseq }
  0x21   :  { %v827_v17 = vld [vmem:[%s1179_s5] sm:$0xff]   ;;  %v828_v18 = vld [vmem:[%s1179_s5 + $0x8] sm:$0xff]   ;;  %v829_v27 = vld [vmem:[%s1179_s5 + $0x10] sm:$0xff]  }
  0x22   :  { %749 = vmatpush3.bf16.msra.mxu0 %v825_v7  ;;  %757 = vmatpush3.bf16.msra.mxu1 %v827_v17  ;;  %v1030_v20 = vand.u32 127, %v58_v19  ;;  %v830_v28 = vld [vmem:[%s1179_s5 + $0x18] sm:$0xff]   ;;  %v831_v29 = vld [vmem:[%s1179_s5 + $0x20] sm:$0xff]   ;;  %v832_v30 = vld [vmem:[%s1179_s5 + $0x28] sm:$0xff]  }
  0x23   :  { %750 = vmatprep.subr.bf16.mxu0 %v883_v1  ;;  %758 = vmatprep.subr.bf16.mxu1 %v883_v1  ;;  %v833_v31 = vld [vmem:[%s1179_s5 + $0x30] sm:$0xff]   ;;  %v834_v32 = vld [vmem:[%s1179_s5 + $0x38] sm:$0xff]   ;;  %v665_v37 = vld [vmem:[%s1177_s3] ss:$0 sm:$0xff] }
  0x24   :  { %vm60_vm1 = vcmp.lt.s32.totalorder %v1030_v20, 32  ;;  %v666_v39 = vld [vmem:[%s1178_s4] ss:$0 sm:$0xff]  ;;  %v836_v52 = vld [vmem:[%s1183_s9 + $0x8] sm:$0xff]   ;;  %v837_v58 = vld [vmem:[%s1183_s9 + $0x10] sm:$0xff]   ;;  %vm63_vm5 = vcmp.lt.s32.totalorder %v1030_v20, 8 }
  0x25   :  { %v1034_v23 = vsel %vm60_vm1, 1.0, %v883_v1  ;;  %v667_v45 = vld [vmem:[%s1180_s6] ss:$0 sm:$0xff]  ;;  %v838_v59 = vld [vmem:[%s1183_s9 + $0x18] sm:$0xff]   ;;  %v840_v61 = vld [vmem:[%s1183_s9 + $0x28] sm:$0xff]  }
  0x26   :  { %v66_v9 = vld [vmem:[%s1196_s29] sm:$0xff]  ;;  %751 = vmatpush3.bf16.msra.mxu0 %v826_v8  ;;  %759 = vmatpush3.bf16.msra.mxu1 %v828_v18  ;;  %v841_v62 = vld [vmem:[%s1183_s9 + $0x30] sm:$0xff]   ;;  %v842_v63 = vld [vmem:[%s1183_s9 + $0x38] sm:$0xff]  }
  0x27   :  { %v67_v10 = vpack.c.bf16 %v66_v9, %v66_v9  ;;  %776 = vmatprep.subr.bf16.mxu0 %v883_v1  ;;  %760 = vmatprep.subr.bf16.mxu1 %v883_v1  ;;  %v835_v51 = vld [vmem:[%s1183_s9] sm:$0xff]  }
  0x28   :  { %v839_v60 = vld [vmem:[%s1183_s9 + $0x20] sm:$0xff]   ;;  %s885_s9 = smov [#allocation2]  }
  0x29   :  { %753 = vmatmul.mubr.bf16.vlgmr.msra.gmra.mrb[0].mxu0 %v67_v10  ;;  %v676_v5 = vld [vmem:[%s1181_s7] ss:$0 sm:$0xff]  ;;  %s646_s3 = sshll.u32 %s885_s9, 4  ;;  %s647_s3 = int_to_ptr.vmem [resolvable:$true] %s646_s3 }
  0x2a   :  { %792 = vmatprep.mubr.msk.bf16.mxu0 %vm884_vm0, %v883_v1  ;;  %761 = vmatpush3.bf16.msra.mxu1 %v829_v27  ;;  %v677_v7 = vld [vmem:[%s1182_s8] ss:$0 sm:$0xff]  ;;  %s859_s7 = scalar_lea.vmem %s647_s3, 128  ;;  %p864_p1 = scmp.lt.s32.totalorder %s647_s3, %s647_s3 }
  0x2b   :  { %762 = vmatprep.subr.bf16.mxu1 %v883_v1  ;;  %777 = vmatpush3.bf16.msra.mxu0 %v835_v51  ;;  %v843_v19 = vld [vmem:[%s1187_s13] sm:$0xff]   ;;  %p860_p0 = scmp.ne.s32.totalorder %s647_s3, %s859_s7  ;;  %p865_p2 = scmp.lt.s32.totalorder %s859_s7, %s859_s7 }
  0x2c   :  { %778 = vmatprep.subr.bf16.mxu0 %v883_v1  ;;  %v699_v20 = vld [vmem:[%s1190_s16] ss:$0 sm:$0xff] }
  0x2d   :  { %p866_p3 = por %p865_p2, %p864_p1 }
  0x2e   :  { %763 = vmatpush3.bf16.msra.mxu1 %v830_v28  ;;  %v845_v28 = vld [vmem:[%s1187_s13 + $0x10] sm:$0xff]  }
  0x2f   :  { %764 = vmatprep.subr.bf16.mxu1 %v883_v1  ;;  %779 = vmatpush3.bf16.msra.mxu0 %v836_v52  ;;  %p867_p4 = pnand %p866_p3, %p860_p0 }
  0x30   :  { %780 = vmatprep.subr.bf16.mxu0 %v883_v1 }
  0x32   :  { %765 = vmatpush3.bf16.msra.mxu1 %v831_v29  ;;  %v846_v29 = vld [vmem:[%s1187_s13 + $0x18] sm:$0xff]  }
  0x33   :  { %766 = vmatprep.subr.bf16.mxu1 %v883_v1  ;;  %781 = vmatpush3.bf16.msra.mxu0 %v837_v58 }
  0x34   :  { %782 = vmatprep.subr.bf16.mxu0 %v883_v1 }
  0x36   :  { %767 = vmatpush3.bf16.msra.mxu1 %v832_v30  ;;  %v848_v30 = vld [vmem:[%s1187_s13 + $0x28] sm:$0xff]  }
  0x37   :  { %768 = vmatprep.subr.bf16.mxu1 %v883_v1  ;;  %783 = vmatpush3.bf16.msra.mxu0 %v838_v59 }
  0x38   :  { %784 = vmatprep.subr.bf16.mxu0 %v883_v1 }
  0x3a   :  { %769 = vmatpush3.bf16.msra.mxu1 %v833_v31  ;;  %v849_v31 = vld [vmem:[%s1187_s13 + $0x30] sm:$0xff]  }
  0x3b   :  { %770 = vmatprep.subr.bf16.mxu1 %v883_v1  ;;  %785 = vmatpush3.bf16.msra.mxu0 %v839_v60 }
  0x3c   :  { %786 = vmatprep.subr.bf16.mxu0 %v883_v1 }
  0x3e   :  { %771 = vmatpush3.bf16.msra.mxu1 %v834_v32  ;;  %v850_v32 = vld [vmem:[%s1187_s13 + $0x38] sm:$0xff]  }
  0x3f   :  { %796 = vmatprep.subr.bf16.mxu1 %v883_v1  ;;  %787 = vmatpush3.bf16.msra.mxu0 %v840_v61  ;;  %v698_v61 = vld [vmem:[%s1189_s15] ss:$0 sm:$0xff] }
  0x40   :  { %788 = vmatprep.subr.bf16.mxu0 %v883_v1 }
  0x43   :  { %789 = vmatpush3.bf16.msra.mxu0 %v841_v62 }
  0x44   :  { %790 = vmatprep.subr.bf16.mxu0 %v883_v1 }
  0x47   :  { %791 = vmatpush3.bf16.msra.mxu0 %v842_v63 }
  0xfc   :  { %v173_v12 = vpop.f32.mrb[0].mxu0 }
  0xfd   :  { %v174_v13 = vadd.f32 %v656_v11, %v173_v12  ;;  %v754_v14 = vpop.f32.mrb[1].mxu0 }
  0xfe   :  { %v176_v15 = vpop.f32.mrb[2].mxu0 }
  0xff   :  { %179 = vadd.xlane.f32.xlu0 %v174_v13  ;;  %v755_v16 = vpop.f32.mrb[3].mxu0 }
 0x18c   :  { %v180_v21 = vpop.xlane.xlu0 %179 }
 0x18d   :  { %v181_v22 = vmul.f32 0.03125, %v180_v21  ;;  %v844_v21 = vld [vmem:[%s1187_s13 + $0x8] sm:$0xff]  }
 0x18f   :  { %v182_v24 = vsub.f32 %v174_v13, %v181_v22  ;;  %v678_v13 = vld [vmem:[%s1184_s10] ss:$0 sm:$0xff] }
 0x191   :  { %v183_v25 = vmul.f32 %v1034_v23, %v182_v24 }
 0x193   :  { %v184_v26 = vmul.f32 %v183_v25, %v183_v25 }
 0x195   :  { %185 = vadd.xlane.f32.xlu0 %v184_v26 }
 0x222   :  { %v186_v33 = vpop.xlane.xlu0 %185 }
 0x223   :  { %v187_v34 = vmul.f32 0.03125, %v186_v33 }
 0x225   :  { %v188_v35 = vadd.f32 1e-05, %v187_v34 }
 0x227   :  { %851 = vrsqrt.f32 %v188_v35 }
 0x231   :  { %v852_v36 = vpop.eup %851 }
 0x232   :  { %v190_v38 = vmul.f32 %v852_v36, %v183_v25 }
 0x234   :  { %v198_v40 = vmul.f32 %v665_v37, %v190_v38  ;;  %v687_v37 = vld [vmem:[%s1185_s11] ss:$0 sm:$0xff] }
 0x236   :  { %v206_v41 = vadd.f32 %v666_v39, %v198_v40  ;;  %v688_v39 = vld [vmem:[%s1186_s12] ss:$0 sm:$0xff] }
 0x238   :  { %vm207_vm2 = vcmp.ge.f32.partialorder %v206_v41, 0.0  ;;  %v208_v42 = vmul.f32 0.01, %v206_v41 }
 0x23a   :  { %v209_v43 = vsel %vm207_vm2, %v206_v41, %v208_v42 }
 0x23b   :  { %v210_v44 = vpack.c.bf16 %v209_v43, %v209_v43 }
 0x23d   :  { %773 = vmatmul.mubr.bf16.vlgmr.msra.gmra.mrb[0].mxu1 %v210_v44 }
 0x23e   :  { %812 = vmatprep.mubr.msk.bf16.mxu1 %vm884_vm0, %v883_v1  ;;  %797 = vmatpush3.bf16.msra.mxu1 %v843_v19 }
 0x23f   :  { %798 = vmatprep.subr.bf16.mxu1 %v883_v1 }
 0x242   :  { %799 = vmatpush3.bf16.msra.mxu1 %v844_v21 }
 0x243   :  { %800 = vmatprep.subr.bf16.mxu1 %v883_v1 }
 0x246   :  { %801 = vmatpush3.bf16.msra.mxu1 %v845_v28 }
 0x247   :  { %802 = vmatprep.subr.bf16.mxu1 %v883_v1 }
 0x24a   :  { %803 = vmatpush3.bf16.msra.mxu1 %v846_v29 }
 0x24b   :  { %804 = vmatprep.subr.bf16.mxu1 %v883_v1 }
 0x310   :  { %v316_v46 = vpop.f32.mrb[0].mxu1 }
 0x311   :  { %v317_v47 = vadd.f32 %v667_v45, %v316_v46  ;;  %v774_v48 = vpop.f32.mrb[1].mxu1  ;;  %v689_v45 = vld [vmem:[%s1188_s14] ss:$0 sm:$0xff] }
 0x312   :  { %v319_v49 = vpop.f32.mrb[2].mxu1 }
 0x313   :  { %322 = vadd.xlane.f32.xlu1 %v317_v47  ;;  %v775_v50 = vpop.f32.mrb[3].mxu1 }
 0x3a0   :  { %v323_v53 = vpop.xlane.xlu1 %322 }
 0x3a1   :  { %v324_v54 = vmul.f32 0.03125, %v323_v53  ;;  %v655_v53 = vsel %vm63_vm5, 1.0, %v883_v1 }
 0x3a3   :  { %v325_v55 = vsub.f32 %v317_v47, %v324_v54 }
 0x3a5   :  { %v326_v56 = vmul.f32 %v1034_v23, %v325_v55 }
 0x3a7   :  { %v327_v57 = vmul.f32 %v326_v56, %v326_v56 }
 0x3a9   :  { %328 = vadd.xlane.f32.xlu1 %v327_v57 }
 0x436   :  { %v329_v0 = vpop.xlane.xlu1 %328 }
 0x437   :  { %v330_v2 = vmul.f32 0.03125, %v329_v0 }
 0x439   :  { %v331_v3 = vadd.f32 1e-05, %v330_v2 }
 0x43b   :  { %853 = vrsqrt.f32 %v331_v3 }
 0x445   :  { %v854_v4 = vpop.eup %853 }
 0x446   :  { %v333_v6 = vmul.f32 %v854_v4, %v326_v56 }
 0x448   :  { %v341_v8 = vmul.f32 %v676_v5, %v333_v6 }
 0x44a   :  { %v349_v9 = vadd.f32 %v677_v7, %v341_v8 }
 0x44c   :  { %vm350_vm3 = vcmp.ge.f32.partialorder %v349_v9, 0.0  ;;  %v351_v10 = vmul.f32 0.01, %v349_v9 }
 0x44e   :  { %v352_v11 = vsel %vm350_vm3, %v349_v9, %v351_v10 }
 0x44f   :  { %v353_v12 = vpack.c.bf16 %v352_v11, %v352_v11 }
 0x451   :  { %793 = vmatmul.mubr.bf16.vlgmr.msra.gmra.mrb[4].mxu0 %v353_v12 }
 0x524   :  { %v459_v14 = vpop.f32.mrb[4].mxu0 }
 0x525   :  { %v460_v15 = vadd.f32 %v678_v13, %v459_v14  ;;  %v794_v16 = vpop.f32.mrb[5].mxu0 }
 0x526   :  { %v462_v17 = vpop.f32.mrb[6].mxu0 }
 0x527   :  { %465 = vadd.xlane.f32.xlu0 %v460_v15  ;;  %v795_v18 = vpop.f32.mrb[7].mxu0 }
 0x5b4   :  { %v466_v22 = vpop.xlane.xlu0 %465 }
 0x5b5   :  { %v467_v24 = vmul.f32 0.03125, %v466_v22 }
 0x5b7   :  { %v468_v25 = vsub.f32 %v460_v15, %v467_v24 }
 0x5b9   :  { %v469_v26 = vmul.f32 %v1034_v23, %v468_v25  ;;  %v847_v23 = vld [vmem:[%s1187_s13 + $0x20] sm:$0xff]  }
 0x5ba   :  { %805 = vmatpush3.bf16.msra.mxu1 %v847_v23 }
 0x5bb   :  { %v470_v27 = vmul.f32 %v469_v26, %v469_v26  ;;  %806 = vmatprep.subr.bf16.mxu1 %v883_v1 }
 0x5bd   :  { %471 = vadd.xlane.f32.xlu1 %v470_v27 }
 0x5be   :  { %807 = vmatpush3.bf16.msra.mxu1 %v848_v30 }
 0x5bf   :  { %808 = vmatprep.subr.bf16.mxu1 %v883_v1 }
 0x5c2   :  { %809 = vmatpush3.bf16.msra.mxu1 %v849_v31 }
 0x5c3   :  { %810 = vmatprep.subr.bf16.mxu1 %v883_v1 }
 0x5c6   :  { %811 = vmatpush3.bf16.msra.mxu1 %v850_v32 }
 0x64a   :  { %v472_v33 = vpop.xlane.xlu1 %471 }
 0x64b   :  { %v473_v34 = vmul.f32 0.03125, %v472_v33 }
 0x64d   :  { %v474_v35 = vadd.f32 1e-05, %v473_v34 }
 0x64f   :  { %855 = vrsqrt.f32 %v474_v35 }
 0x659   :  { %v856_v36 = vpop.eup %855 }
 0x65a   :  { %v476_v38 = vmul.f32 %v856_v36, %v469_v26 }
 0x65c   :  { %v484_v40 = vmul.f32 %v687_v37, %v476_v38 }
 0x65e   :  { %v492_v41 = vadd.f32 %v688_v39, %v484_v40 }
 0x660   :  { %vm493_vm4 = vcmp.ge.f32.partialorder %v492_v41, 0.0  ;;  %v494_v42 = vmul.f32 0.01, %v492_v41 }
 0x662   :  { %v495_v43 = vsel %vm493_vm4, %v492_v41, %v494_v42 }
 0x663   :  { %v496_v44 = vpack.c.bf16 %v495_v43, %v495_v43 }
 0x665   :  { %813 = vmatmul.mubr.bf16.vlgmr.msra.gmra.mrb[4].mxu1 %v496_v44 }
 0x738   :  { %v602_v46 = vpop.f32.mrb[4].mxu1 }
 0x739   :  { %v603_v47 = vadd.f32 %v689_v45, %v602_v46  ;;  %v814_v48 = vpop.f32.mrb[5].mxu1 }
 0x73a   :  { %v605_v49 = vpop.f32.mrb[6].mxu1 }
 0x73b   :  { %608 = vadd.xlane.f32.xlu0 %v603_v47  ;;  %v815_v50 = vpop.f32.mrb[7].mxu1 }
 0x7c8   :  { %v609_v51 = vpop.xlane.xlu0 %608 }
 0x7c9   :  { %v610_v52 = vmul.f32 0.125, %v609_v51 }
 0x7cb   :  { %v611_v54 = vsub.f32 %v603_v47, %v610_v52 }
 0x7cd   :  { %v612_v55 = vmul.f32 %v655_v53, %v611_v54 }
 0x7cf   :  { %v613_v56 = vmul.f32 %v612_v55, %v612_v55 }
 0x7d1   :  { %614 = vadd.xlane.f32.xlu1 %v613_v56 }
 0x85e   :  { %v615_v57 = vpop.xlane.xlu1 %614 }
 0x85f   :  { %v616_v58 = vmul.f32 0.125, %v615_v57 }
 0x861   :  { %v617_v59 = vadd.f32 1e-05, %v616_v58 }
 0x863   :  { %857 = vrsqrt.f32 %v617_v59 }
 0x86d   :  { %v858_v60 = vpop.eup %857 }
 0x86e   :  { %v619_v62 = vmul.f32 %v858_v60, %v612_v55 }
 0x870   :  { %v627_v63 = vmul.f32 %v698_v61, %v619_v62 }
 0x872   :  { %v635_v1 = vadd.f32 %v699_v20, %v627_v63 }
 0x874   :  { %vm636_vm6 = vcmp.ge.f32.partialorder %v635_v1, 0.0  ;;  %v637_v0 = vmul.f32 0.01, %v635_v1 }
 0x876   :  { %v638_v2 = vsel %vm636_vm6, %v635_v1, %v637_v0 }
 0x877   :  { %639 = vst [vmem:[#allocation2] sm:$0xff] %v638_v2 }
 0x878   :  { %870 = shalt.err (!%p867_p4)
}
 0x879   :  { %s871_s16 = scalar_lea.hbm %s1191_s17, 128 }
 0x87a   :  { %p872_p5 = scmp.ne.s32.totalorder %s1191_s17, %s871_s16  ;;  %p875_p6 = scmp.lt.u32.totalorder %s871_s16, %s1191_s17 }
 0x87c   :  { %p877_p7 = pnand %p875_p6, %p872_p5 }
 0x87e   :  { %880 = shalt.err (!%p877_p7)
}
 0x87f   :  { %649 = dma.vmem_to_hbm [thread:$0]  %s647_s3, 128, %s1191_s17, [#allocation3]  }
 0x880   :  { %881 = dma.done.wait [#allocation3], 128  }
 0x881   :  { %882 = vsyncadd [#allocation3], 4294967168 }
 0x882   :  { %653 = vsyncpa [#allocation3], 1 }

</bundles_post_ra>
